<compile_context>
chip_gen: v7x
topology: tpu7x:2x2x1
jax: 0.10.0
libtpu: 0.0.40
codegen_flags: <defaults>
</compile_context>

<pallas_src>
import jax
import jax.numpy as jnp
from jax.experimental import pallas as pl
from jax.experimental.pallas import tpu as pltpu


def _classifier_kernel(
    emb_ref, mask_ref, cond_ref, struct_ref,
    w_enc_ref, b_enc_ref, w_sim_ref,
    w1m_ref, w1s_ref, b1_ref, w2_ref, b2_ref,
    predict_ref, logp_ref, attn_ref,
):
    TB, S, E = emb_ref.shape
    H = w_enc_ref.shape[1]

    # ---- encoder: hseq = tanh(emb @ W_enc + b_enc), all TB*S rows at once ---
    emb2d = emb_ref[...].reshape(TB * S, E)                     # [TB*S, E]
    hseq2d = jnp.tanh(
        jnp.dot(emb2d, w_enc_ref[...], preferred_element_type=jnp.float32)
        + b_enc_ref[...])
    hseq = hseq2d.reshape(TB, S, H)                             # [TB, S, H] f32

    # ---- attention: bilinear similarity (MXU) + masked softmax --------------
    proj = jnp.dot(cond_ref[...], w_sim_ref[...],
                   preferred_element_type=jnp.float32)          # [TB, H]
    # batched contraction over H on the MXU (flash-style bqd,bkd->bqk pattern)
    scores = jnp.einsum('bqh,bsh->bqs', proj[:, None, :], hseq,
                        preferred_element_type=jnp.float32)[:, 0, :]  # [TB, S]
    mask = mask_ref[...]                                        # [TB, S]
    scores = jnp.where(mask > 0, scores, jnp.full_like(scores, -1e30))
    m = jnp.max(scores, axis=-1, keepdims=True)                 # [TB, 1]
    p = jnp.exp(scores - m) * mask                              # exact 0 at pads
    denom = jnp.sum(p, axis=-1, keepdims=True)
    attn = p / jnp.maximum(denom, 1e-30)                        # 0 if fully padded
    attn_ref[...] = attn

    # ---- mix = bmm(attn.unsqueeze(1), hseq).squeeze(1) on the MXU -----------
    mix = jnp.einsum('bqs,bsh->bqh', attn[:, None, :], hseq,
                     preferred_element_type=jnp.float32)[:, 0, :]    # [TB, H]

    # ---- decoder on concat([mix, structured]) via split matmul --------------
    h1 = (jnp.dot(mix, w1m_ref[...], preferred_element_type=jnp.float32)
          + jnp.dot(struct_ref[...], w1s_ref[...],
                    preferred_element_type=jnp.float32)
          + b1_ref[...])
    h1 = jnp.maximum(h1, 0.0)
    potential = (jnp.dot(h1, w2_ref[...], preferred_element_type=jnp.float32)
                 + b2_ref[...])                                 # [TB, C]

    # ---- predictor: stable softmax probabilities + log-probs ----------------
    lm = jnp.max(potential, axis=-1, keepdims=True)
    z = potential - lm
    ez = jnp.exp(z)
    se = jnp.sum(ez, axis=-1, keepdims=True)
    predict_ref[...] = ez / se
    logp_ref[...] = z - jnp.log(se)


def seq_classifier_forward(emb, mask, cond, struct, y1h, weight, params,
                           *, tile_b=128, use_bf16=True):
    """emb:[B,S,E] mask:[B,S] cond:[B,Cc] struct:[B,Ds] y1h:[B,C] weight:[B]"""
    B, S, E = emb.shape
    H = params["w_enc"].shape[1]
    Cc = cond.shape[-1]
    Ds = struct.shape[-1]
    Hd = params["w1m"].shape[1]
    C = params["w2"].shape[1]

    # ---- batch tiling: one grid step processes TB samples -------------------
    if B <= tile_b:
        TB = B
    else:
        TB = max(8, (tile_b // 8) * 8)      # multiple of 8 for sublane tiling
    G = -(-B // TB)
    B_pad = G * TB

    mm_dtype = jnp.bfloat16 if use_bf16 else jnp.float32
    # cast the big activation + encoder weight for the bf16 MXU (f32 accum);
    # elementwise math (tanh/exp/softmax) stays f32 inside the kernel (v5e-safe).
    emb_in = emb.astype(mm_dtype)
    w_enc = params["w_enc"].astype(mm_dtype)

    def pad_b(x):
        if B_pad == B:
            return x
        return jnp.pad(x, [(0, B_pad - B)] + [(0, 0)] * (x.ndim - 1))

    emb_in = pad_b(emb_in)
    mask_in = pad_b(mask.astype(jnp.float32))
    cond_in = pad_b(cond.astype(jnp.float32))
    struct_in = pad_b(struct.astype(jnp.float32))

    def tile(block_shape):
        n = len(block_shape) - 1
        return pl.BlockSpec(tuple(block_shape),
                            lambda i, _n=n: (i,) + (0,) * _n)

    def shared(shape):
        n = len(shape)
        return pl.BlockSpec(tuple(shape), lambda i, _n=n: (0,) * _n)

    in_specs = [
        tile((TB, S, E)),              # emb
        tile((TB, S)),                 # mask (lane-dense, S last)
        tile((TB, Cc)),                # conditional
        tile((TB, Ds)),                # structured data
        shared((E, H)), shared((1, H)), shared((Cc, H)),
        shared((H, Hd)), shared((Ds, Hd)), shared((1, Hd)),
        shared((Hd, C)), shared((1, C)),
    ]
    out_specs = (
        tile((TB, C)),                 # predict (softmax probs)
        tile((TB, C)),                 # log-probs (for the CE loss)
        tile((TB, S)),                 # attention weights (lane-dense)
    )
    out_shape = (
        jax.ShapeDtypeStruct((B_pad, C), jnp.float32),
        jax.ShapeDtypeStruct((B_pad, C), jnp.float32),
        jax.ShapeDtypeStruct((B_pad, S), jnp.float32),
    )

    predict, logp, attn = pl.pallas_call(
        _classifier_kernel,
        out_shape=out_shape,
        grid_spec=pltpu.PrefetchScalarGridSpec(
            num_scalar_prefetch=0,
            grid=(G,),
            in_specs=in_specs,
            out_specs=out_specs,
        ),
        # no cross-iteration state -> batch axis is parallel (v7x megacore)
        compiler_params=pltpu.CompilerParams(
            dimension_semantics=("parallel",)),
    )(emb_in, mask_in, cond_in, struct_in,
      w_enc, params["b_enc"], params["w_sim"],
      params["w1m"], params["w1s"], params["b1"],
      params["w2"], params["b2"])

    predict = predict[:B]
    logp = logp[:B]
    attn = attn[:B]

    # predictor's weighted cross-entropy: scalar reduction kept out of the
    # kernel (removes the serial accumulator; avoids 4-byte per-step DMAs).
    nll = -jnp.sum(y1h * logp, axis=-1)                          # [B]
    w = weight.reshape(B).astype(jnp.float32)
    loss = jnp.sum(w * nll) / jnp.maximum(jnp.sum(w), 1e-12)

    return predict, loss, attn


if __name__ == "__main__":
    B, S, E, H = 2, 8, 32, 32
    Ccond, Dst, Hd, C = 16, 8, 32, 4
    vocab = 50

    ks = jax.random.split(jax.random.PRNGKey(0), 10)

    # deterministic synthetic parameters
    params = dict(
        w_enc=jax.random.normal(ks[0], (E, H), jnp.float32) * 0.1,
        b_enc=jnp.zeros((1, H), jnp.float32),
        w_sim=jax.random.normal(ks[1], (Ccond, H), jnp.float32) * 0.1,
        w1m=jax.random.normal(ks[2], (H, Hd), jnp.float32) * 0.1,
        w1s=jax.random.normal(ks[3], (Dst, Hd), jnp.float32) * 0.1,
        b1=jnp.zeros((1, Hd), jnp.float32),
        w2=jax.random.normal(ks[4], (Hd, C), jnp.float32) * 0.1,
        b2=jnp.zeros((1, C), jnp.float32),
    )
    emb_table = jax.random.normal(ks[5], (vocab, E), jnp.float32) * 0.1

    # deterministic synthetic batch
    seq = jax.random.randint(ks[6], (B, S), 0, vocab)
    lengths = jnp.array([S, 5], dtype=jnp.int32)
    mask = (jnp.arange(S)[None, :] < lengths[:, None]).astype(jnp.float32)  # [B,S]
    cond = jax.random.normal(ks[7], (B, Ccond), jnp.float32)
    structured = jax.random.normal(ks[8], (B, Dst), jnp.float32)
    y = jax.random.randint(ks[9], (B,), 0, C)
    y1h = jax.nn.one_hot(y, C, dtype=jnp.float32)                           # [B,C]
    weight = jnp.array([1.0, 2.0], jnp.float32)                             # [B]

    # glue: embedding lookup (gather)
    emb = jnp.take(emb_table, seq, axis=0)                                  # [B,S,E]

    predict, loss, attn = seq_classifier_forward(
        emb, mask, cond, structured, y1h, weight, params)
    jax.block_until_ready((predict, loss, attn))

    assert bool(jnp.all(jnp.isfinite(predict))) and bool(jnp.isfinite(loss))
    assert bool(jnp.all(jnp.abs(jnp.sum(predict, axis=-1) - 1.0) < 1e-3))
    assert bool(jnp.all(jnp.abs(jnp.sum(attn, axis=-1) - 1.0) < 1e-3))
    assert bool(jnp.all(attn * (1.0 - mask) == 0.0))  # padded positions -> 0 attn
    print("KERNEL_OK")
</pallas_src>

<mosaic_0001>
module attributes {stable_mosaic.version = 11 : i64} {
  func.func @_classifier_kernel(%arg0: i32, %arg1: memref<2x8x32xbf16, #tpu.memory_space<vmem>>, %arg2: memref<2x8xf32, #tpu.memory_space<vmem>>, %arg3: memref<2x16xf32, #tpu.memory_space<vmem>>, %arg4: memref<2x8xf32, #tpu.memory_space<vmem>>, %arg5: memref<32x32xbf16, #tpu.memory_space<vmem>>, %arg6: memref<1x32xf32, #tpu.memory_space<vmem>>, %arg7: memref<16x32xf32, #tpu.memory_space<vmem>>, %arg8: memref<32x32xf32, #tpu.memory_space<vmem>>, %arg9: memref<8x32xf32, #tpu.memory_space<vmem>>, %arg10: memref<1x32xf32, #tpu.memory_space<vmem>>, %arg11: memref<32x4xf32, #tpu.memory_space<vmem>>, %arg12: memref<1x4xf32, #tpu.memory_space<vmem>>, %arg13: memref<2x4xf32, #tpu.memory_space<vmem>>, %arg14: memref<2x4xf32, #tpu.memory_space<vmem>>, %arg15: memref<2x8xf32, #tpu.memory_space<vmem>>) attributes {dimension_semantics = [#tpu.dimension_semantics<parallel>], iteration_bounds = array<i64: 1>, scalar_prefetch = 0 : i64, scratch_operands = 0 : i64, tpu.core_type = #tpu.core_type<tc>, window_params = [{transform_indices = @transform_0, window_bounds = array<i64: 2, 8, 32>}, {transform_indices = @transform_1, window_bounds = array<i64: 2, 8>}, {transform_indices = @transform_2, window_bounds = array<i64: 2, 16>}, {transform_indices = @transform_3, window_bounds = array<i64: 2, 8>}, {pipeline_mode = #tpu.pipeline_mode<synchronous>, transform_indices = @transform_4, window_bounds = array<i64: 32, 32>}, {pipeline_mode = #tpu.pipeline_mode<synchronous>, transform_indices = @transform_5, window_bounds = array<i64: 1, 32>}, {pipeline_mode = #tpu.pipeline_mode<synchronous>, transform_indices = @transform_6, window_bounds = array<i64: 16, 32>}, {pipeline_mode = #tpu.pipeline_mode<synchronous>, transform_indices = @transform_7, window_bounds = array<i64: 32, 32>}, {pipeline_mode = #tpu.pipeline_mode<synchronous>, transform_indices = @transform_8, window_bounds = array<i64: 8, 32>}, {pipeline_mode = #tpu.pipeline_mode<synchronous>, transform_indices = @transform_9, window_bounds = array<i64: 1, 32>}, {pipeline_mode = #tpu.pipeline_mode<synchronous>, transform_indices = @transform_10, window_bounds = array<i64: 32, 4>}, {pipeline_mode = #tpu.pipeline_mode<synchronous>, transform_indices = @transform_11, window_bounds = array<i64: 1, 4>}, {transform_indices = @transform_12, window_bounds = array<i64: 2, 4>}, {transform_indices = @transform_13, window_bounds = array<i64: 2, 4>}, {transform_indices = @transform_14, window_bounds = array<i64: 2, 8>}]} {
    %c0 = arith.constant 0 : index
    %c0_0 = arith.constant 0 : index
    %c0_1 = arith.constant 0 : index
    %0 = vector.load %arg1[%c0, %c0_0, %c0_1] : memref<2x8x32xbf16, #tpu.memory_space<vmem>>, vector<2x8x32xbf16>
    %1 = vector.shape_cast %0 : vector<2x8x32xbf16> to vector<16x32xbf16>
    %c0_2 = arith.constant 0 : index
    %c0_3 = arith.constant 0 : index
    %2 = vector.load %arg5[%c0_2, %c0_3] : memref<32x32xbf16, #tpu.memory_space<vmem>>, vector<32x32xbf16>
    %cst = arith.constant dense<0.000000e+00> : vector<16x32xf32>
    %3 = tpu.matmul %1, %2, %cst {dimension_numbers = #tpu.dot_dimension_numbers<[1], [0], [0], [1], [0, 0, 1, 1], [], []>} : vector<16x32xbf16>, vector<32x32xbf16>, vector<16x32xf32> -> vector<16x32xf32>
    %c0_4 = arith.constant 0 : index
    %c0_5 = arith.constant 0 : index
    %4 = vector.load %arg6[%c0_4, %c0_5] : memref<1x32xf32, #tpu.memory_space<vmem>>, vector<1x32xf32>
    %5 = vector.broadcast %4 : vector<1x32xf32> to vector<16x32xf32>
    %6 = arith.addf %3, %5 : vector<16x32xf32>
    %7 = math.tanh %6 : vector<16x32xf32>
    %8 = vector.shape_cast %7 : vector<16x32xf32> to vector<2x8x32xf32>
    %c0_6 = arith.constant 0 : index
    %c0_7 = arith.constant 0 : index
    %9 = vector.load %arg3[%c0_6, %c0_7] : memref<2x16xf32, #tpu.memory_space<vmem>>, vector<2x16xf32>
    %c0_8 = arith.constant 0 : index
    %c0_9 = arith.constant 0 : index
    %10 = vector.load %arg7[%c0_8, %c0_9] : memref<16x32xf32, #tpu.memory_space<vmem>>, vector<16x32xf32>
    %cst_10 = arith.constant dense<0.000000e+00> : vector<2x32xf32>
    %11 = tpu.matmul %9, %10, %cst_10 {dimension_numbers = #tpu.dot_dimension_numbers<[1], [0], [0], [1], [0, 0, 1, 1], [], []>} : vector<2x16xf32>, vector<16x32xf32>, vector<2x32xf32> -> vector<2x32xf32>
    %12 = vector.shape_cast %11 : vector<2x32xf32> to vector<2x1x32xf32>
    "tpu.trace_start"() <{level = 10 : i32, message = "bqh,bsh->bqs"}> : () -> ()
    %cst_11 = arith.constant dense<0.000000e+00> : vector<2x1x8xf32>
    %13 = tpu.matmul %12, %8, %cst_11 {dimension_numbers = #tpu.dot_dimension_numbers<[2], [2], [1], [1], [0, 0, 0, 1, 1, 1], [0], [0]>} : vector<2x1x32xf32>, vector<2x8x32xf32>, vector<2x1x8xf32> -> vector<2x1x8xf32>
    "tpu.trace_stop"() : () -> ()
    %14 = vector.shape_cast %13 : vector<2x1x8xf32> to vector<2x8xf32>
    %c0_12 = arith.constant 0 : index
    %c0_13 = arith.constant 0 : index
    %15 = vector.load %arg2[%c0_12, %c0_13] : memref<2x8xf32, #tpu.memory_space<vmem>>, vector<2x8xf32>
    %cst_14 = arith.constant 0.000000e+00 : f32
    %16 = vector.broadcast %cst_14 : f32 to vector<2x8xf32>
    %17 = arith.cmpf ogt, %15, %16 : vector<2x8xf32>
    %cst_15 = arith.constant -1.000000e+30 : f32
    %18 = vector.broadcast %cst_15 : f32 to vector<2x8xf32>
    %19 = arith.select %17, %14, %18 : vector<2x8xi1>, vector<2x8xf32>
    %cst_16 = arith.constant dense<0xFF800000> : vector<2xf32>
    %20 = vector.multi_reduction <maximumf>, %19, %cst_16 [1] : vector<2x8xf32> to vector<2xf32>
    %21 = vector.shape_cast %20 : vector<2xf32> to vector<2x1xf32>
    %22 = vector.broadcast %21 : vector<2x1xf32> to vector<2x8xf32>
    %23 = arith.subf %19, %22 : vector<2x8xf32>
    %24 = math.exp %23 : vector<2x8xf32>
    %25 = arith.mulf %24, %15 : vector<2x8xf32>
    %cst_17 = arith.constant dense<0.000000e+00> : vector<2xf32>
    %26 = vector.multi_reduction <add>, %25, %cst_17 [1] : vector<2x8xf32> to vector<2xf32>
    %27 = vector.shape_cast %26 : vector<2xf32> to vector<2x1xf32>
    %cst_18 = arith.constant 1.000000e-30 : f32
    %28 = vector.broadcast %cst_18 : f32 to vector<2x1xf32>
    %29 = arith.maximumf %27, %28 : vector<2x1xf32>
    %30 = vector.broadcast %29 : vector<2x1xf32> to vector<2x8xf32>
    %31 = arith.divf %25, %30 : vector<2x8xf32>
    %c0_19 = arith.constant 0 : index
    %c0_20 = arith.constant 0 : index
    %32 = vector.load %arg15[%c0_19, %c0_20] : memref<2x8xf32, #tpu.memory_space<vmem>>, vector<2x8xf32>
    tpu.vector_store %arg15[%c0_19, %c0_20], %31 {strides = array<i32>} : memref<2x8xf32, #tpu.memory_space<vmem>>, vector<2x8xf32>,
    %33 = vector.shape_cast %31 : vector<2x8xf32> to vector<2x1x8xf32>
    "tpu.trace_start"() <{level = 10 : i32, message = "bqs,bsh->bqh"}> : () -> ()
    %cst_21 = arith.constant dense<0.000000e+00> : vector<2x1x32xf32>
    %34 = tpu.matmul %33, %8, %cst_21 {dimension_numbers = #tpu.dot_dimension_numbers<[2], [1], [1], [2], [0, 0, 0, 1, 1, 2], [0], [0]>} : vector<2x1x8xf32>, vector<2x8x32xf32>, vector<2x1x32xf32> -> vector<2x1x32xf32>
    "tpu.trace_stop"() : () -> ()
    %35 = vector.shape_cast %34 : vector<2x1x32xf32> to vector<2x32xf32>
    %c0_22 = arith.constant 0 : index
    %c0_23 = arith.constant 0 : index
    %36 = vector.load %arg8[%c0_22, %c0_23] : memref<32x32xf32, #tpu.memory_space<vmem>>, vector<32x32xf32>
    %cst_24 = arith.constant dense<0.000000e+00> : vector<2x32xf32>
    %37 = tpu.matmul %35, %36, %cst_24 {dimension_numbers = #tpu.dot_dimension_numbers<[1], [0], [0], [1], [0, 0, 1, 1], [], []>} : vector<2x32xf32>, vector<32x32xf32>, vector<2x32xf32> -> vector<2x32xf32>
    %c0_25 = arith.constant 0 : index
    %c0_26 = arith.constant 0 : index
    %38 = vector.load %arg4[%c0_25, %c0_26] : memref<2x8xf32, #tpu.memory_space<vmem>>, vector<2x8xf32>
    %c0_27 = arith.constant 0 : index
    %c0_28 = arith.constant 0 : index
    %39 = vector.load %arg9[%c0_27, %c0_28] : memref<8x32xf32, #tpu.memory_space<vmem>>, vector<8x32xf32>
    %cst_29 = arith.constant dense<0.000000e+00> : vector<2x32xf32>
    %40 = tpu.matmul %38, %39, %cst_29 {dimension_numbers = #tpu.dot_dimension_numbers<[1], [0], [0], [1], [0, 0, 1, 1], [], []>} : vector<2x8xf32>, vector<8x32xf32>, vector<2x32xf32> -> vector<2x32xf32>
    %41 = arith.addf %37, %40 : vector<2x32xf32>
    %c0_30 = arith.constant 0 : index
    %c0_31 = arith.constant 0 : index
    %42 = vector.load %arg10[%c0_30, %c0_31] : memref<1x32xf32, #tpu.memory_space<vmem>>, vector<1x32xf32>
    %43 = vector.broadcast %42 : vector<1x32xf32> to vector<2x32xf32>
    %44 = arith.addf %41, %43 : vector<2x32xf32>
    %cst_32 = arith.constant 0.000000e+00 : f32
    %45 = vector.broadcast %cst_32 : f32 to vector<2x32xf32>
    %46 = arith.maximumf %44, %45 : vector<2x32xf32>
    %c0_33 = arith.constant 0 : index
    %c0_34 = arith.constant 0 : index
    %47 = vector.load %arg11[%c0_33, %c0_34] : memref<32x4xf32, #tpu.memory_space<vmem>>, vector<32x4xf32>
    %cst_35 = arith.constant dense<0.000000e+00> : vector<2x4xf32>
    %48 = tpu.matmul %46, %47, %cst_35 {dimension_numbers = #tpu.dot_dimension_numbers<[1], [0], [0], [1], [0, 0, 1, 1], [], []>} : vector<2x32xf32>, vector<32x4xf32>, vector<2x4xf32> -> vector<2x4xf32>
    %c0_36 = arith.constant 0 : index
    %c0_37 = arith.constant 0 : index
    %49 = vector.load %arg12[%c0_36, %c0_37] : memref<1x4xf32, #tpu.memory_space<vmem>>, vector<1x4xf32>
    %50 = vector.broadcast %49 : vector<1x4xf32> to vector<2x4xf32>
    %51 = arith.addf %48, %50 : vector<2x4xf32>
    %cst_38 = arith.constant dense<0xFF800000> : vector<2xf32>
    %52 = vector.multi_reduction <maximumf>, %51, %cst_38 [1] : vector<2x4xf32> to vector<2xf32>
    %53 = vector.shape_cast %52 : vector<2xf32> to vector<2x1xf32>
    %54 = vector.broadcast %53 : vector<2x1xf32> to vector<2x4xf32>
    %55 = arith.subf %51, %54 : vector<2x4xf32>
    %56 = math.exp %55 : vector<2x4xf32>
    %cst_39 = arith.constant dense<0.000000e+00> : vector<2xf32>
    %57 = vector.multi_reduction <add>, %56, %cst_39 [1] : vector<2x4xf32> to vector<2xf32>
    %58 = vector.shape_cast %57 : vector<2xf32> to vector<2x1xf32>
    %59 = vector.broadcast %58 : vector<2x1xf32> to vector<2x4xf32>
    %60 = arith.divf %56, %59 : vector<2x4xf32>
    %c0_40 = arith.constant 0 : index
    %c0_41 = arith.constant 0 : index
    %61 = vector.load %arg13[%c0_40, %c0_41] : memref<2x4xf32, #tpu.memory_space<vmem>>, vector<2x4xf32>
    tpu.vector_store %arg13[%c0_40, %c0_41], %60 {strides = array<i32>} : memref<2x4xf32, #tpu.memory_space<vmem>>, vector<2x4xf32>,
    %62 = math.log %58 : vector<2x1xf32>
    %63 = vector.broadcast %62 : vector<2x1xf32> to vector<2x4xf32>
    %64 = arith.subf %55, %63 : vector<2x4xf32>
    %c0_42 = arith.constant 0 : index
    %c0_43 = arith.constant 0 : index
    %65 = vector.load %arg14[%c0_42, %c0_43] : memref<2x4xf32, #tpu.memory_space<vmem>>, vector<2x4xf32>
    tpu.vector_store %arg14[%c0_42, %c0_43], %64 {strides = array<i32>} : memref<2x4xf32, #tpu.memory_space<vmem>>, vector<2x4xf32>,
    return
  }
  func.func @transform_0(%arg0: i32) -> (i32, i32, i32) {
    %c0_i32 = arith.constant 0 : i32
    %c0_i32_0 = arith.constant 0 : i32
    %c0_i32_1 = arith.constant 0 : i32
    return %arg0, %c0_i32, %c0_i32_0 : i32, i32, i32
  }
  func.func @transform_1(%arg0: i32) -> (i32, i32) {
    %c0_i32 = arith.constant 0 : i32
    %c0_i32_0 = arith.constant 0 : i32
    return %arg0, %c0_i32 : i32, i32
  }
  func.func @transform_2(%arg0: i32) -> (i32, i32) {
    %c0_i32 = arith.constant 0 : i32
    %c0_i32_0 = arith.constant 0 : i32
    return %arg0, %c0_i32 : i32, i32
  }
  func.func @transform_3(%arg0: i32) -> (i32, i32) {
    %c0_i32 = arith.constant 0 : i32
    %c0_i32_0 = arith.constant 0 : i32
    return %arg0, %c0_i32 : i32, i32
  }
  func.func @transform_4(%arg0: i32) -> (i32, i32) {
    %c0_i32 = arith.constant 0 : i32
    %c0_i32_0 = arith.constant 0 : i32
    %c0_i32_1 = arith.constant 0 : i32
    return %c0_i32, %c0_i32_0 : i32, i32
  }
  func.func @transform_5(%arg0: i32) -> (i32, i32) {
    %c0_i32 = arith.constant 0 : i32
    %c0_i32_0 = arith.constant 0 : i32
    %c0_i32_1 = arith.constant 0 : i32
    return %c0_i32, %c0_i32_0 : i32, i32
  }
  func.func @transform_6(%arg0: i32) -> (i32, i32) {
    %c0_i32 = arith.constant 0 : i32
    %c0_i32_0 = arith.constant 0 : i32
    %c0_i32_1 = arith.constant 0 : i32
    return %c0_i32, %c0_i32_0 : i32, i32
  }
  func.func @transform_7(%arg0: i32) -> (i32, i32) {
    %c0_i32 = arith.constant 0 : i32
    %c0_i32_0 = arith.constant 0 : i32
    %c0_i32_1 = arith.constant 0 : i32
    return %c0_i32, %c0_i32_0 : i32, i32
  }
  func.func @transform_8(%arg0: i32) -> (i32, i32) {
    %c0_i32 = arith.constant 0 : i32
    %c0_i32_0 = arith.constant 0 : i32
    %c0_i32_1 = arith.constant 0 : i32
    return %c0_i32, %c0_i32_0 : i32, i32
  }
  func.func @transform_9(%arg0: i32) -> (i32, i32) {
    %c0_i32 = arith.constant 0 : i32
    %c0_i32_0 = arith.constant 0 : i32
    %c0_i32_1 = arith.constant 0 : i32
    return %c0_i32, %c0_i32_0 : i32, i32
  }
  func.func @transform_10(%arg0: i32) -> (i32, i32) {
    %c0_i32 = arith.constant 0 : i32
    %c0_i32_0 = arith.constant 0 : i32
    %c0_i32_1 = arith.constant 0 : i32
    return %c0_i32, %c0_i32_0 : i32, i32
  }
  func.func @transform_11(%arg0: i32) -> (i32, i32) {
    %c0_i32 = arith.constant 0 : i32
    %c0_i32_0 = arith.constant 0 : i32
    %c0_i32_1 = arith.constant 0 : i32
    return %c0_i32, %c0_i32_0 : i32, i32
  }
  func.func @transform_12(%arg0: i32) -> (i32, i32) {
    %c0_i32 = arith.constant 0 : i32
    %c0_i32_0 = arith.constant 0 : i32
    return %arg0, %c0_i32 : i32, i32
  }
  func.func @transform_13(%arg0: i32) -> (i32, i32) {
    %c0_i32 = arith.constant 0 : i32
    %c0_i32_0 = arith.constant 0 : i32
    return %arg0, %c0_i32 : i32, i32
  }
  func.func @transform_14(%arg0: i32) -> (i32, i32) {
    %c0_i32 = arith.constant 0 : i32
    %c0_i32_0 = arith.constant 0 : i32
    return %arg0, %c0_i32 : i32, i32
  }
}

</mosaic_0001>

<bundles_post_ra>
// kernel: tpu_custom_call.1
= control target key start
LH: loop header
LB: loop body
LE: loop exit
PB: predicated region body
PF: predicated region fallthrough
CT: control target
= control target key end

     0   :  { %20 = vsyncpa [#allocation3], 0  ;;  %s1562_s0 = inlined_call_operand.vmem [shape: bf16[2,8,32], index: 0, kind: input, shape index: {}]   ;;  %s1563_s1 = inlined_call_operand.vmem [shape: f32[2,8], index: 1, kind: input, shape index: {}]   ;;  %s1564_s2 = inlined_call_operand.hbm [shape: f32[2,16], index: 2, kind: input, shape index: {}]   ;;  %s1565_s3 = inlined_call_operand.hbm [shape: f32[2,8], index: 3, kind: input, shape index: {}]   ;;  %s1566_s4 = inlined_call_operand.vmem [shape: bf16[32,32], index: 4, kind: input, shape index: {}]   ;;  %s1567_s5 = inlined_call_operand.hbm [shape: f32[1,32], index: 5, kind: input, shape index: {}]   ;;  %s1568_s6 = inlined_call_operand.hbm [shape: f32[16,32], index: 6, kind: input, shape index: {}]   ;;  %s1569_s7 = inlined_call_operand.vmem [shape: f32[32,32], index: 7, kind: input, shape index: {}]   ;;  %s1570_s8 = inlined_call_operand.vmem [shape: f32[8,32], index: 8, kind: input, shape index: {}]   ;;  %s1571_s9 = inlined_call_operand.hbm [shape: f32[1,32], index: 9, kind: input, shape index: {}]   ;;  %s1572_s10 = inlined_call_operand.vmem [shape: f32[32,4], index: 10, kind: input, shape index: {}]   ;;  %s1573_s11 = inlined_call_operand.vmem [shape: f32[1,4], index: 11, kind: input, shape index: {}]   ;;  %s1574_s12 = inlined_call_operand.hbm [shape: f32[2,4], index: 12, kind: output, shape index: {0}]   ;;  %s1575_s13 = inlined_call_operand.hbm [shape: f32[2,4], index: 13, kind: output, shape index: {1}]   ;;  %s1576_s14 = inlined_call_operand.hbm [shape: f32[2,8], index: 14, kind: output, shape index: {2}]  }
   0x1   :  { %21 = vsyncpa [#allocation6], 0 }
   0x2   :  { %22 = vsyncpa [#allocation9], 0 }
   0x3   :  { %23 = vsyncpa [#allocation4], 0 }
   0x4   :  { %24 = vsyncpa [#allocation13], 0  ;;  %s1272_s29 = smov [#allocation5]   ;;  %s1273_s15 = smov [#allocation8]  }
   0x5   :  { %s45_s30 = sshll.u32 %s1272_s29, 4  ;;  %s66_s16 = sshll.u32 %s1273_s15, 4  ;;  %s46_s30 = int_to_ptr.vmem [resolvable:$true] %s45_s30  ;;  %s1361_s16 = int_to_ptr.vmem [resolvable:$true] %s66_s16 }
   0x6   :  { %s1086_s19 = scalar_lea.hbm %s1565_s3, 32 }
   0x7   :  { %p1087_p0 = scmp.ne.s32.totalorder %s1565_s3, %s1086_s19  ;;  %p1090_p1 = scmp.lt.u32.totalorder %s1086_s19, %s1565_s3 }
   0x9   :  { %p1092_p2 = pnand %p1090_p1, %p1087_p0 }
   0xb   :  { %1095 = shalt.err (!%p1092_p2)
}
   0xc   :  { %s1096_s24 = scalar_lea.vmem %s46_s30, 32  ;;  %p1101_p4 = scmp.lt.s32.totalorder %s46_s30, %s46_s30 }
   0xd   :  { %p1097_p3 = scmp.ne.s32.totalorder %s46_s30, %s1096_s24  ;;  %p1102_p5 = scmp.lt.s32.totalorder %s1096_s24, %s1096_s24 }
   0xf   :  { %p1103_p6 = por %p1102_p5, %p1101_p4 }
  0x11   :  { %p1104_p7 = pnand %p1103_p6, %p1097_p3 }
  0x13   :  { %1107 = shalt.err (!%p1104_p7)
}
  0x14   :  { %48 = dma.hbm_to_vmem [thread:$0]  %s1565_s3, 32, %s46_s30, [#allocation6]  }
  0x15   :  { %s1108_s29 = scalar_lea.hbm %s1568_s6, 256 }
  0x16   :  { %p1109_p8 = scmp.ne.s32.totalorder %s1568_s6, %s1108_s29  ;;  %p1112_p9 = scmp.lt.u32.totalorder %s1108_s29, %s1568_s6 }
  0x18   :  { %p1114_p10 = pnand %p1112_p9, %p1109_p8 }
  0x1a   :  { %1117 = shalt.err (!%p1114_p10)
}
  0x1b   :  { %s1118_s20 = scalar_lea.vmem %s1361_s16, 256  ;;  %p1123_p12 = scmp.lt.s32.totalorder %s1361_s16, %s1361_s16 }
  0x1c   :  { %p1119_p11 = scmp.ne.s32.totalorder %s1361_s16, %s1118_s20  ;;  %p1124_p13 = scmp.lt.s32.totalorder %s1118_s20, %s1118_s20 }
  0x1e   :  { %p1125_p0 = por %p1124_p13, %p1123_p12 }
  0x20   :  { %p1126_p1 = pnand %p1125_p0, %p1119_p11 }
  0x22   :  { %1129 = shalt.err (!%p1126_p1)
}
  0x23   :  { %s1274_s3 = smov 128   ;;  %s1275_s30 = smov 8  }
  0x24   :  { %72 = dma.hbm_to_vmem [thread:$0]  %s1568_s6, 256, %s1361_s16, [#allocation9], %s1274_s3, %s1274_s3, %s1275_s30  }
  0x25   :  { %s1276_s23 = smov [#allocation2]   ;;  %s1277_s25 = smov [#allocation7]  }
  0x26   :  { %s35_s24 = sshll.u32 %s1276_s23, 4  ;;  %s57_s26 = sshll.u32 %s1277_s25, 4  ;;  %s36_s24 = int_to_ptr.vmem [resolvable:$true] %s35_s24  ;;  %s58_s26 = int_to_ptr.vmem [resolvable:$true] %s57_s26 }
  0x27   :  { %s1130_s29 = scalar_lea.hbm %s1564_s2, 32 }
  0x28   :  { %p1131_p2 = scmp.ne.s32.totalorder %s1564_s2, %s1130_s29  ;;  %p1134_p3 = scmp.lt.u32.totalorder %s1130_s29, %s1564_s2 }
  0x2a   :  { %p1136_p4 = pnand %p1134_p3, %p1131_p2 }
  0x2c   :  { %1139 = shalt.err (!%p1136_p4)
}
  0x2d   :  { %s1140_s6 = scalar_lea.vmem %s36_s24, 32  ;;  %p1145_p6 = scmp.lt.s32.totalorder %s36_s24, %s36_s24 }
  0x2e   :  { %p1141_p5 = scmp.ne.s32.totalorder %s36_s24, %s1140_s6  ;;  %p1146_p7 = scmp.lt.s32.totalorder %s1140_s6, %s1140_s6 }
  0x30   :  { %p1147_p8 = por %p1146_p7, %p1145_p6 }
  0x32   :  { %p1148_p9 = pnand %p1147_p8, %p1141_p5 }
  0x34   :  { %1151 = shalt.err (!%p1148_p9)
}
  0x35   :  { %38 = dma.hbm_to_vmem [thread:$0]  %s1564_s2, 32, %s36_s24, [#allocation3]  }
  0x36   :  { %s1152_s21 = scalar_lea.hbm %s1567_s5, 16 }
  0x37   :  { %p1153_p10 = scmp.ne.s32.totalorder %s1567_s5, %s1152_s21  ;;  %p1156_p11 = scmp.lt.u32.totalorder %s1152_s21, %s1567_s5 }
  0x39   :  { %p1158_p12 = pnand %p1156_p11, %p1153_p10 }
  0x3b   :  { %1161 = shalt.err (!%p1158_p12)
}
  0x3c   :  { %s1162_s28 = scalar_lea.vmem %s58_s26, 16  ;;  %s1166_s29 = scalar_lea.vmem %s58_s26, 32 }
  0x3d   :  { %p1163_p13 = scmp.ne.s32.totalorder %s58_s26, %s1162_s28  ;;  %p1167_p0 = scmp.lt.s32.totalorder %s58_s26, %s58_s26 }
  0x3e   :  { %p1168_p1 = scmp.lt.s32.totalorder %s1166_s29, %s1162_s28 }
  0x40   :  { %p1169_p2 = por %p1168_p1, %p1167_p0 }
  0x42   :  { %p1170_p3 = pnand %p1169_p2, %p1163_p13 }
  0x44   :  { %1173 = shalt.err (!%p1170_p3)
}
  0x45   :  { %60 = dma.hbm_to_vmem [thread:$0]  %s1567_s5, 16, %s58_s26, [#allocation6]  }
  0x46   :  { %s1278_s15 = smov [#allocation10]   ;;  %s1174_s6 = scalar_lea.hbm %s1571_s9, 16 }
  0x47   :  { %s83_s17 = sshll.u32 %s1278_s15, 4  ;;  %p1175_p4 = scmp.ne.s32.totalorder %s1571_s9, %s1174_s6  ;;  %s84_s17 = int_to_ptr.vmem [resolvable:$true] %s83_s17 }
  0x48   :  { %p1178_p5 = scmp.lt.u32.totalorder %s1174_s6, %s1571_s9 }
  0x4a   :  { %p1180_p6 = pnand %p1178_p5, %p1175_p4 }
  0x4c   :  { %1183 = shalt.err (!%p1180_p6)
}
  0x4d   :  { %s1184_s21 = scalar_lea.vmem %s84_s17, 16  ;;  %s1188_s5 = scalar_lea.vmem %s84_s17, 32 }
  0x4e   :  { %p1185_p7 = scmp.ne.s32.totalorder %s84_s17, %s1184_s21  ;;  %p1189_p8 = scmp.lt.s32.totalorder %s84_s17, %s84_s17 }
  0x4f   :  { %p1190_p9 = scmp.lt.s32.totalorder %s1188_s5, %s1184_s21 }
  0x51   :  { %p1191_p10 = por %p1190_p9, %p1189_p8 }
  0x53   :  { %p1192_p11 = pnand %p1191_p10, %p1185_p7 }
  0x55   :  { %1195 = shalt.err (!%p1192_p11)
}
  0x56   :  { %86 = dma.hbm_to_vmem [thread:$0]  %s1571_s9, 16, %s84_s17, [#allocation9]  }
  0x57   :  { %1262 = dma.done.wait [#allocation3], 32  }
  0x58   :  { %1263 = vsyncadd [#allocation3], 4294967264 }
  0x59   :  { %1264 = dma.done.wait [#allocation6], 48  }
  0x5a   :  { %1265 = vsyncadd [#allocation6], 4294967248 }
  0x5b   :  { %1266 = dma.done.wait [#allocation9], 272  }
  0x5c   :  { %1267 = vsyncadd [#allocation9], 4294967024  ;;  %v1279_v0 = vmov 0.0   ;;  %vm1280_vm0 = vmmov 0   ;;  %v1281_v1 = vmov 0.0|0.0   ;;  %v1069_v2 = vld [vmem:[%s1566_s4] sm:$0xff]   ;;  %v265_v11 = vlaneseq }
  0x5d   :  { %978 = vmatprep.subr.bf16.mxu0 %v1279_v0  ;;  %982 = vmatprep.mubr.msk.bf16.mxu0 %vm1280_vm0, %v1279_v0  ;;  %v1070_v3 = vld [vmem:[%s1566_s4 + $0x8] sm:$0xff]   ;;  %v1071_v7 = vld [vmem:[%s1562_s0] sm:$0xff]   ;;  %vm137_vm1 = vcmask 261120   ;;  %vm187_vm2 = vcmask 130048   ;;  %v1282_v9 = vmov 1966171168  }
  0x5e   :  { %1040 = vmatprep.subr.bf16.mxu1 %v1281_v1  ;;  %990 = vmatprep.mubr.msk.f32.mxu1 %vm1280_vm0, %v1279_v0  ;;  %v185_v4 = vld [vmem:[#allocation8] sm:$0xff]  ;;  %v186_v5 = vld [vmem:[#allocation8 + $0x8] sm:$0xff]  ;;  %v184_v8 = vld [vmem:[#allocation2] sm:$0x3]  ;;  %v263_v10 = vunpack.c.l.s4 %v1282_v9  ;;  %v266_v18 = vshrl.u32 %v265_v11, 7  ;;  %vm439_vm3 = vcmask 1041409  }
  0x5f   :  { %979 = vmatpush3.bf16.msra.mxu0 %v1069_v2  ;;  %v1041_v6 = vpack.c.bf16 %v186_v5, %v185_v4  ;;  %v935_v12 = vld [vmem:[#allocation7] ss:$0 sm:$0xff]  ;;  %v434_v32 = vld [vmem:[%s1563_s1] sm:$0x3]  ;;  %vm443_vm5 = vcmask 58368   ;;  %v627_v51 = vld [vmem:[%s1569_s7 + $0x8] sm:$0xff] }
  0x60   :  { %980 = vmatprep.subr.bf16.mxu0 %v1279_v0  ;;  %v264_v17 = vunpack.c.0.s8 %v263_v10  ;;  %vm435_vm4 = vcmp.gt.f32.partialorder %v434_v32, 0.0  ;;  %v626_v50 = vld [vmem:[%s1569_s7] sm:$0xff]  ;;  %vm481_vm6 = vcmask 64512   ;;  %v628_v56 = vld [vmem:[%s1569_s7 + $0x10] sm:$0xff]  ;;  %v629_v57 = vld [vmem:[%s1569_s7 + $0x18] sm:$0xff]  ;;  %vm874_vm7 = vcmask 25600  }
  0x61   :  { %1042 = vmatpush3.bf16.msra.mxu1 %v1041_v6  ;;  %v1044_v54 = vpack.c.bf16 %v627_v51, %v626_v50  ;;  %v1047_v58 = vpack.c.bf16 %v629_v57, %v628_v56  ;;  %v631_v59 = vld [vmem:[%s1570_s8] sm:$0xff]  ;;  %v791_v6 = vld [vmem:[%s1572_s10 + $0x8] sm:$0xff]  ;;  %v792_v9 = vld [vmem:[%s1572_s10 + $0x10] sm:$0xff]  ;;  %s1284_s25 = smov [#allocation12]   ;;  %s1285_s28 = smov [#allocation14]  }
  0x62   :  { %993 = vmatprep.subr.mxu1 %v1279_v0  ;;  %v267_v23 = vsub.s32 %v264_v17, %v266_v18  ;;  %v630_v60 = vld [vmem:[#allocation5] sm:$0x3]  ;;  %v793_v10 = vld [vmem:[%s1572_s10 + $0x18] sm:$0xff]  ;;  %s907_s27 = sshll.u32 %s1284_s25, 4  ;;  %s917_s29 = sshll.u32 %s1285_s28, 4  ;;  %s1517_s27 = int_to_ptr.vmem [resolvable:$true] %s907_s27  ;;  %s918_s29 = int_to_ptr.vmem [resolvable:$true] %s917_s29 }
  0x63   :  { %981 = vmatpush3.bf16.msra.mxu0 %v1070_v3  ;;  %v790_v5 = vld [vmem:[%s1572_s10] sm:$0xff]  ;;  %v1053_v11 = vpack.c.bf16 %v793_v10, %v792_v9  ;;  %s1283_s10 = smov [#allocation11]  }
  0x64   :  { %1003 = vmatprep.subr.mxu0 %v1279_v0  ;;  %991 = vmatmul.mubr.msk.f32.vlgmr.msra.gmra.mrb[0].mxu1 %vm187_vm2, %v184_v8 }
  0x65   :  { %995 = vmatprep.mubr.msk.f32.mxu1 %vm1280_vm0, %v1279_v0 }
  0x66   :  { %983 = vmatmul.mubr.msk.bf16.vlgmr.msra.gmra.mrb[0].mxu0 %vm137_vm1, %v1071_v7  ;;  %v1050_v7 = vpack.c.bf16 %v791_v6, %v790_v5 }
  0x67   :  { %1005 = vmatprep.mubr.msk.f32.mxu0 %vm1280_vm0, %v1279_v0 }
 0x137   :  { %v257_v14 = vpop.f32.mrb[0].mxu1 }
 0x138   :  { %v992_v19 = vpop.f32.mrb[1].mxu1  ;;  %v268_v24 = vrot.slane %v257_v14, %v267_v23 }
 0x139   :  { %v175_v13 = vpop.f32.mrb[0].mxu0 }
 0x13a   :  { %v176_v15 = vadd.f32 %v935_v12, %v175_v13  ;;  %v984_v16 = vpop.f32.mrb[1].mxu0  ;;  %v276_v26 = vrot.slane %v268_v24, %v267_v23  ;;  %v269_v27 = vcombine.high %v268_v24, %v268_v24  ;;  %v949_v13 = vld [vmem:[#allocation10] ss:$0 sm:$0xff] }
 0x13b   :  { %v178_v20 = vpop.f32.mrb[2].mxu0 }
 0x13c   :  { %1072 = vtanh.f32 %v176_v15  ;;  %v179_v21 = vadd.f32 %v935_v12, %v178_v20  ;;  %v985_v22 = vpop.f32.mrb[3].mxu0  ;;  %v283_v29 = vrot.slane %v269_v27, %v267_v23 }
 0x13e   :  { %1074 = vtanh.f32 %v179_v21 }
 0x146   :  { %v1073_v25 = vpop.eup %1072 }
 0x147   :  { %994 = vmatpush3.xpose.msk.msra.mxu1 %vm137_vm1, %v1073_v25  ;;  %1004 = vmatpush3.msra.mxu0 %v1073_v25 }
 0x148   :  { %998 = vmatprep.subr.mxu1 %v1279_v0  ;;  %1013 = vmatprep.subr.mxu0 %v1279_v0  ;;  %v1075_v28 = vpop.eup %1074 }
 0x14a   :  { %996 = vmatmul.mubr.msk.f32.vlgmr.msra.gmra.mrb[2].mxu1 %vm137_vm1, %v276_v26 }
 0x14b   :  { %999 = vmatpush3.xpose.msk.msra.mxu1 %vm137_vm1, %v1075_v28  ;;  %1000 = vmatprep.mubr.msk.f32.mxu1 %vm1280_vm0, %v1279_v0 }
 0x14c   :  { %1008 = vmatprep.subr.mxu1 %v1279_v0 }
 0x14e   :  { %1001 = vmatmul.mubr.msk.f32.vlgmr.msra.gmra.mrb[4].mxu1 %vm137_vm1, %v283_v29 }
 0x14f   :  { %1009 = vmatpush3.msra.mxu1 %v1075_v28  ;;  %1010 = vmatprep.mubr.msk.f32.mxu1 %vm1280_vm0, %v1279_v0 }
 0x150   :  { %1043 = vmatprep.subr.bf16.mxu1 %v1281_v1 }
 0x21d   :  { %v355_v30 = vpop.f32.mrb[2].mxu1 }
 0x21e   :  { %v997_v31 = vpop.f32.mrb[3].mxu1 }
 0x221   :  { %v430_v33 = vpop.f32.mrb[4].mxu1 }
 0x222   :  { %v438_v34 = vrot.slane %v430_v33, 7  ;;  %v1002_v35 = vpop.f32.mrb[5].mxu1 }
 0x224   :  { %v440_v36 = vsel %vm439_vm3, %v438_v34, %v355_v30 }
 0x225   :  { %v442_v37 = vsel %vm435_vm4, %v440_v36, -1e+30 }
 0x226   :  { %v444_v38 = vsel %vm443_vm5, %v442_v37, -inf }
 0x227   :  { %445 = vmax.xlane.f32.xlu0 %v444_v38 }
 0x2b4   :  { %v446_v39 = vpop.xlane.xlu0 %445 }
 0x2b5   :  { %v447_v40 = vsub.f32 %v442_v37, %v446_v39 }
 0x2b7   :  { %v448_v41 = vmul.f32 1.442695, %v447_v40 }
 0x2b9   :  { %1076 = vpow2.f32 %v448_v41 }
 0x2c3   :  { %v1077_v42 = vpop.eup %1076 }
 0x2c4   :  { %v450_v43 = vmul.f32 %v1077_v42, %v434_v32 }
 0x2c6   :  { %v451_v44 = vsel %vm443_vm5, %v450_v43, 0.0 }
 0x2c7   :  { %452 = vadd.xlane.f32.xlu0 %v451_v44 }
 0x354   :  { %v453_v45 = vpop.xlane.xlu0 %452 }
 0x355   :  { %v454_v46 = vmax.f32 %v453_v45, 1e-30 }
 0x357   :  { %1078 = vrcp.f32 %v454_v46 }
 0x361   :  { %v1079_v47 = vpop.eup %1078 }
 0x362   :  { %v456_v48 = vmul.f32 %v1079_v47, %v450_v43 }
 0x364   :  { %v465_v49 = vrot.slane %v456_v48, %v267_v23  ;;  %457 = vst.msk [vmem:[#allocation14] sm:$0x3] %vm443_vm5, %v456_v48 }
 0x366   :  { %v473_v52 = vrot.slane %v465_v49, %v267_v23  ;;  %v466_v53 = vcombine.high %v465_v49, %v465_v49 }
 0x368   :  { %1006 = vmatmul.mubr.msk.f32.vlgmr.msra.gmra.mrb[4].mxu0 %vm481_vm6, %v473_v52  ;;  %v480_v55 = vrot.slane %v466_v53, %v267_v23 }
 0x369   :  { %1015 = vmatprep.mubr.msk.f32.mxu0 %vm1280_vm0, %v1279_v0  ;;  %1014 = vmatpush3.msra.mxu0 %v631_v59 }
 0x36a   :  { %1011 = vmatmul.mubr.msk.f32.vlgmr.msra.gmra.mrb[6].mxu1 %vm481_vm6, %v480_v55  ;;  %1049 = vmatprep.subr.bf16.mxu0 %v1281_v1 }
 0x36b   :  { %1045 = vmatpush3.bf16.msra.mxu1 %v1044_v54  ;;  %1026 = vmatprep.mubr.msk.f32.mxu1 %vm1280_vm0, %v1279_v0 }
 0x36c   :  { %1046 = vmatprep.subr.bf16.mxu1 %v1281_v1  ;;  %1016 = vmatmul.mubr.msk.f32.vlgmr.msra.gmra.mrb[6].mxu0 %vm481_vm6, %v630_v60 }
 0x36d   :  { %1037 = vmatprep.mubr.msk.f32.mxu0 %vm1280_vm0, %v1279_v0  ;;  %1051 = vmatpush3.bf16.msra.mxu0 %v1050_v7 }
 0x36e   :  { %1052 = vmatprep.subr.bf16.mxu0 %v1281_v1  ;;  %v950_v1 = vld [vmem:[%s1573_s11] ss:$0 sm:$0xff]  ;;  %s897_s11 = sshll.u32 %s1283_s10, 4  ;;  %s898_s11 = int_to_ptr.vmem [resolvable:$true] %s897_s11 }
 0x36f   :  { %1048 = vmatpush3.bf16.msra.mxu1 %v1047_v58  ;;  %s1196_s0 = scalar_lea.vmem %s898_s11, 32  ;;  %p1201_p13 = scmp.lt.s32.totalorder %s898_s11, %s898_s11 }
 0x370   :  { %p1197_p12 = scmp.ne.s32.totalorder %s898_s11, %s1196_s0  ;;  %p1202_p0 = scmp.lt.s32.totalorder %s1196_s0, %s1196_s0 }
 0x371   :  { %1054 = vmatpush3.bf16.msra.mxu0 %v1053_v11 }
 0x372   :  { %p1203_p1 = por %p1202_p0, %p1201_p13 }
 0x374   :  { %p1204_p2 = pnand %p1203_p1, %p1197_p12 }
 0x43b   :  { %v550_v61 = vpop.f32.mrb[4].mxu0 }
 0x43c   :  { %v1007_v62 = vpop.f32.mrb[5].mxu0 }
 0x43d   :  { %v622_v63 = vpop.f32.mrb[6].mxu1 }
 0x43e   :  { %v707_v2 = vrot.slane %v622_v63, 7  ;;  %v1012_v3 = vpop.f32.mrb[7].mxu1 }
 0x43f   :  { %v701_v8 = vpop.f32.mrb[6].mxu0 }
 0x440   :  { %v708_v4 = vsel %vm439_vm3, %v707_v2, %v550_v61  ;;  %v1017_v0 = vpop.f32.mrb[7].mxu0 }
 0x441   :  { %1027 = vmatmul.mubr.msk.f32.vlgmr.msra.gmra.mrb[8].mxu1 %vm137_vm1, %v708_v4 }
 0x514   :  { %v777_v12 = vpop.f32.mrb[8].mxu1 }
 0x515   :  { %v778_v14 = vadd.f32 %v777_v12, %v701_v8  ;;  %v1028_v15 = vpop.f32.mrb[9].mxu1 }
 0x517   :  { %v788_v16 = vadd.f32 %v949_v13, %v778_v14 }
 0x519   :  { %v789_v17 = vmax.f32 %v788_v16, 0.0 }
 0x51b   :  { %1038 = vmatmul.mubr.msk.f32.vlgmr.msra.gmra.mrb[8].mxu0 %vm137_vm1, %v789_v17 }
 0x5ee   :  { %v870_v18 = vpop.f32.mrb[8].mxu0 }
 0x5ef   :  { %v871_v19 = vadd.f32 %v950_v1, %v870_v18  ;;  %v1039_v20 = vpop.f32.mrb[9].mxu0 }
 0x5f1   :  { %v875_v21 = vsel %vm874_vm7, %v871_v19, -inf }
 0x5f2   :  { %876 = vmax.xlane.f32.xlu1 %v875_v21 }
 0x67f   :  { %v877_v22 = vpop.xlane.xlu1 %876 }
 0x680   :  { %v878_v23 = vsub.f32 %v871_v19, %v877_v22 }
 0x682   :  { %v879_v24 = vmul.f32 1.442695, %v878_v23 }
 0x684   :  { %1080 = vpow2.f32 %v879_v24 }
 0x68e   :  { %v1081_v25 = vpop.eup %1080 }
 0x68f   :  { %v881_v26 = vsel %vm874_vm7, %v1081_v25, 0.0 }
 0x690   :  { %882 = vadd.xlane.f32.xlu1 %v881_v26 }
 0x71d   :  { %v883_v27 = vpop.xlane.xlu1 %882 }
 0x71e   :  { %1082 = vrcp.f32 %v883_v27 }
 0x71f   :  { %1084 = vlog2.f32 %v883_v27 }
 0x728   :  { %v1083_v28 = vpop.eup %1082 }
 0x729   :  { %v1085_v29 = vpop.eup %1084  ;;  %v885_v30 = vmul.f32 %v1083_v28, %v1081_v25 }
 0x72a   :  { %v888_v31 = vmul.f32 0.6931472, %v1085_v29 }
 0x72b   :  { %886 = vst.msk [vmem:[#allocation11] sm:$0x3] %vm874_vm7, %v885_v30 }
 0x72c   :  { %v889_v32 = vsub.f32 %v878_v23, %v888_v31 }
 0x72d   :  { %1207 = shalt.err (!%p1204_p2)
}
 0x72e   :  { %s1208_s2 = scalar_lea.hbm %s1574_s12, 32 }
 0x72f   :  { %p1209_p3 = scmp.ne.s32.totalorder %s1574_s12, %s1208_s2  ;;  %p1212_p4 = scmp.lt.u32.totalorder %s1208_s2, %s1574_s12 }
 0x731   :  { %p1214_p5 = pnand %p1212_p4, %p1209_p3 }
 0x733   :  { %1217 = shalt.err (!%p1214_p5)
}
 0x734   :  { %900 = dma.vmem_to_hbm [thread:$0]  %s898_s11, 32, %s1574_s12, [#allocation4]   ;;  %890 = vst.msk [vmem:[#allocation12] sm:$0x3] %vm874_vm7, %v889_v32 }
 0x735   :  { %s1218_s16 = scalar_lea.vmem %s1517_s27, 32  ;;  %p1223_p7 = scmp.lt.s32.totalorder %s1517_s27, %s1517_s27 }
 0x736   :  { %p1219_p6 = scmp.ne.s32.totalorder %s1517_s27, %s1218_s16  ;;  %p1224_p8 = scmp.lt.s32.totalorder %s1218_s16, %s1218_s16 }
 0x738   :  { %p1225_p9 = por %p1224_p8, %p1223_p7 }
 0x73a   :  { %p1226_p10 = pnand %p1225_p9, %p1219_p6 }
 0x73c   :  { %1229 = shalt.err (!%p1226_p10)
}
 0x73d   :  { %s1230_s8 = scalar_lea.hbm %s1575_s13, 32 }
 0x73e   :  { %p1231_p11 = scmp.ne.s32.totalorder %s1575_s13, %s1230_s8  ;;  %p1234_p12 = scmp.lt.u32.totalorder %s1230_s8, %s1575_s13 }
 0x740   :  { %p1236_p13 = pnand %p1234_p12, %p1231_p11 }
 0x742   :  { %1239 = shalt.err (!%p1236_p13)
}
 0x743   :  { %910 = dma.vmem_to_hbm [thread:$0]  %s1517_s27, 32, %s1575_s13, [#allocation13]  }
 0x744   :  { %s1240_s22 = scalar_lea.vmem %s918_s29, 32  ;;  %p1245_p1 = scmp.lt.s32.totalorder %s918_s29, %s918_s29 }
 0x745   :  { %p1241_p0 = scmp.ne.s32.totalorder %s918_s29, %s1240_s22  ;;  %p1246_p2 = scmp.lt.s32.totalorder %s1240_s22, %s1240_s22 }
 0x747   :  { %p1247_p3 = por %p1246_p2, %p1245_p1 }
 0x749   :  { %p1248_p4 = pnand %p1247_p3, %p1241_p0 }
 0x74b   :  { %1251 = shalt.err (!%p1248_p4)
}
 0x74c   :  { %s1252_s10 = scalar_lea.hbm %s1576_s14, 32 }
 0x74d   :  { %p1253_p5 = scmp.ne.s32.totalorder %s1576_s14, %s1252_s10  ;;  %p1256_p6 = scmp.lt.u32.totalorder %s1252_s10, %s1576_s14 }
 0x74f   :  { %p1258_p7 = pnand %p1256_p6, %p1253_p5 }
 0x751   :  { %1261 = shalt.err (!%p1258_p7)
}
 0x752   :  { %920 = dma.vmem_to_hbm [thread:$0]  %s918_s29, 32, %s1576_s14, [#allocation13]  }
 0x753   :  { %1268 = dma.done.wait [#allocation4], 32  }
 0x754   :  { %1269 = vsyncadd [#allocation4], 4294967264 }
 0x755   :  { %1270 = dma.done.wait [#allocation13], 64  }
 0x756   :  { %1271 = vsyncadd [#allocation13], 4294967232 }
 0x757   :  { %930 = vsyncpa [#allocation3], 1 }
 0x758   :  { %931 = vsyncpa [#allocation6], 1 }
 0x759   :  { %932 = vsyncpa [#allocation9], 1 }
 0x75a   :  { %933 = vsyncpa [#allocation4], 1 }
 0x75b   :  { %934 = vsyncpa [#allocation13], 1 }

</bundles_post_ra>
